<compile_context>
chip_gen: v7x
topology: tpu7x:2x2x1
jax: 0.10.0
libtpu: 0.0.40
codegen_flags: <defaults>
</compile_context>

<pallas_src>
import jax
import jax.numpy as jnp
from jax.experimental import pallas as pl
from jax.experimental.pallas import tpu as pltpu


def _round_up(x, m):
    return (x + m - 1) // m * m


def _board_embedding_kernel(x_ref, w_ref, gamma_ref, beta_ref, o_ref):
    # x_ref: (tile_m, C+1) flattened pixels with a trailing ones column.
    # w_ref: (C+1, E) conv weight with the bias folded in as the last row.
    x = x_ref[...]

    # 1x1 conv == per-pixel linear projection on the MXU (f32 accumulate), bias included.
    y = jnp.dot(x, w_ref[...], preferred_element_type=jnp.float32)

    # Fused LayerNorm (eps=1e-5, elementwise affine), single-pass statistics:
    # mean = E[y], var = E[y^2] - mean^2  (biased variance, matching nn.LayerNorm).
    inv_e = 1.0 / y.shape[-1]
    s1 = jnp.sum(y, axis=-1, keepdims=True)
    s2 = jnp.sum(y * y, axis=-1, keepdims=True)
    mean = s1 * inv_e
    var = s2 * inv_e - mean * mean
    inv = jax.lax.rsqrt(var + 1e-5)
    o_ref[...] = (y - mean) * inv * gamma_ref[...] + beta_ref[...]


def board_embedding_pallas(x, params, *, tile_m=2048):
    """x: (B, C, H, W) float32 board planes. Returns (B, H*W, E) float32."""
    B, C, H, W = x.shape
    E = params["conv_w"].shape[0]
    M = B * H * W

    # Flatten every pixel of every batch element into one M dimension so a single
    # tiled matmul feeds the MXU, and append a ones column to fold the conv bias in.
    x_nhwc = jnp.transpose(x, (0, 2, 3, 1)).reshape(M, C)
    x2d = jnp.concatenate([x_nhwc, jnp.ones((M, 1), x.dtype)], axis=-1)       # (M, C+1)

    w_t = params["conv_w"].reshape(E, C).T                                    # (C, E)
    w_aug = jnp.concatenate([w_t, params["conv_b"].reshape(1, E)], axis=0)    # (C+1, E)
    gamma = params["ln_gamma"].reshape(1, E)
    beta = params["ln_beta"].reshape(1, E)

    # Row tiling: keep the sublane multiple (8); small inputs collapse to one block.
    tile_m = max(8, _round_up(tile_m, 8))
    if M <= tile_m:
        tile_m = M
    grid = (pl.cdiv(M, tile_m),)  # ragged last block handled by Pallas (no pad/slice)

    out2d = pl.pallas_call(
        _board_embedding_kernel,
        out_shape=jax.ShapeDtypeStruct((M, E), jnp.float32),
        grid=grid,
        in_specs=[
            pl.BlockSpec((tile_m, C + 1), lambda i: (i, 0)),   # flattened pixel rows (+ones)
            pl.BlockSpec((C + 1, E), lambda i: (0, 0)),        # conv weight (bias folded in)
            pl.BlockSpec((1, E), lambda i: (0, 0)),            # LayerNorm gamma
            pl.BlockSpec((1, E), lambda i: (0, 0)),            # LayerNorm beta
        ],
        out_specs=pl.BlockSpec((tile_m, E), lambda i: (i, 0)),
        compiler_params=pltpu.CompilerParams(
            dimension_semantics=("parallel",)),                # use pltpu.CORE_PARALLEL on v7x
    )(x2d, w_aug, gamma, beta)

    return out2d.reshape(B, H * W, E)


def board_embedding_ref(x, params):
    """Pure-JAX reference mirroring BoardEmbedding.forward."""
    B, C, H, W = x.shape
    E = params["conv_w"].shape[0]
    w = params["conv_w"].reshape(E, C)
    y = jnp.einsum("bchw,ec->bhwe", x, w) + params["conv_b"]       # 1x1 conv
    y = y.reshape(B, H * W, E)                                     # permute + reshape
    mean = jnp.mean(y, axis=-1, keepdims=True)
    var = jnp.mean((y - mean) ** 2, axis=-1, keepdims=True)
    return (y - mean) / jnp.sqrt(var + 1e-5) * params["ln_gamma"] + params["ln_beta"]


def init_params(key, input_channels, embed_dim):
    """Synthetic params matching nn.Conv2d(C, E, kernel_size=1) + nn.LayerNorm(E)."""
    k1, k2 = jax.random.split(key)
    return {
        "conv_w": 0.1 * jax.random.normal(k1, (embed_dim, input_channels), jnp.float32),
        "conv_b": 0.01 * jax.random.normal(k2, (embed_dim,), jnp.float32),
        "ln_gamma": jnp.ones((embed_dim,), jnp.float32),
        "ln_beta": jnp.zeros((embed_dim,), jnp.float32),
    }


if __name__ == "__main__":
    B, C, BOARD, E = 2, 16, 4, 256            # batch=2, 16 board planes, 4x4 board, embed 256
    key = jax.random.PRNGKey(0)
    kx, kp = jax.random.split(key)
    x = jax.random.normal(kx, (B, C, BOARD, BOARD), jnp.float32)
    params = init_params(kp, C, E)

    out = board_embedding_pallas(x, params)
    out = jax.block_until_ready(out)

    ref = board_embedding_ref(x, params)
    assert out.shape == (B, BOARD * BOARD, E)
    assert jnp.allclose(out, ref, atol=1e-4, rtol=1e-4), "mismatch vs JAX reference"
    print("KERNEL_OK")
</pallas_src>

<mosaic_0001>
module attributes {stable_mosaic.version = 11 : i64} {
  func.func @_board_embedding_kernel(%arg0: i32, %arg1: memref<32x17xf32, #tpu.memory_space<vmem>>, %arg2: memref<17x256xf32, #tpu.memory_space<vmem>>, %arg3: memref<1x256xf32, #tpu.memory_space<vmem>>, %arg4: memref<1x256xf32, #tpu.memory_space<vmem>>, %arg5: memref<32x256xf32, #tpu.memory_space<vmem>>) attributes {dimension_semantics = [#tpu.dimension_semantics<parallel>], iteration_bounds = array<i64: 1>, scalar_prefetch = 0 : i64, scratch_operands = 0 : i64, tpu.core_type = #tpu.core_type<tc>, window_params = [{transform_indices = @transform_0, window_bounds = array<i64: 32, 17>}, {pipeline_mode = #tpu.pipeline_mode<synchronous>, transform_indices = @transform_1, window_bounds = array<i64: 17, 256>}, {pipeline_mode = #tpu.pipeline_mode<synchronous>, transform_indices = @transform_2, window_bounds = array<i64: 1, 256>}, {pipeline_mode = #tpu.pipeline_mode<synchronous>, transform_indices = @transform_3, window_bounds = array<i64: 1, 256>}, {transform_indices = @transform_4, window_bounds = array<i64: 32, 256>}]} {
    %c0 = arith.constant 0 : index
    %c0_0 = arith.constant 0 : index
    %0 = vector.load %arg1[%c0, %c0_0] : memref<32x17xf32, #tpu.memory_space<vmem>>, vector<32x17xf32>
    %c0_1 = arith.constant 0 : index
    %c0_2 = arith.constant 0 : index
    %1 = vector.load %arg2[%c0_1, %c0_2] : memref<17x256xf32, #tpu.memory_space<vmem>>, vector<17x256xf32>
    %cst = arith.constant dense<0.000000e+00> : vector<32x256xf32>
    %2 = tpu.matmul %0, %1, %cst {dimension_numbers = #tpu.dot_dimension_numbers<[1], [0], [0], [1], [0, 0, 1, 1], [], []>} : vector<32x17xf32>, vector<17x256xf32>, vector<32x256xf32> -> vector<32x256xf32>
    %cst_3 = arith.constant dense<0.000000e+00> : vector<32xf32>
    %3 = vector.multi_reduction <add>, %2, %cst_3 [1] : vector<32x256xf32> to vector<32xf32>
    %4 = vector.shape_cast %3 : vector<32xf32> to vector<32x1xf32>
    %5 = arith.mulf %2, %2 : vector<32x256xf32>
    %cst_4 = arith.constant dense<0.000000e+00> : vector<32xf32>
    %6 = vector.multi_reduction <add>, %5, %cst_4 [1] : vector<32x256xf32> to vector<32xf32>
    %7 = vector.shape_cast %6 : vector<32xf32> to vector<32x1xf32>
    %cst_5 = arith.constant 3.906250e-03 : f32
    %8 = vector.broadcast %cst_5 : f32 to vector<32x1xf32>
    %9 = arith.mulf %4, %8 : vector<32x1xf32>
    %cst_6 = arith.constant 3.906250e-03 : f32
    %10 = vector.broadcast %cst_6 : f32 to vector<32x1xf32>
    %11 = arith.mulf %7, %10 : vector<32x1xf32>
    %12 = arith.mulf %9, %9 : vector<32x1xf32>
    %13 = arith.subf %11, %12 : vector<32x1xf32>
    %cst_7 = arith.constant 9.99999974E-6 : f32
    %14 = vector.broadcast %cst_7 : f32 to vector<32x1xf32>
    %15 = arith.addf %13, %14 : vector<32x1xf32>
    %16 = math.rsqrt %15 : vector<32x1xf32>
    %17 = vector.broadcast %9 : vector<32x1xf32> to vector<32x256xf32>
    %18 = arith.subf %2, %17 : vector<32x256xf32>
    %19 = vector.broadcast %16 : vector<32x1xf32> to vector<32x256xf32>
    %20 = arith.mulf %18, %19 : vector<32x256xf32>
    %c0_8 = arith.constant 0 : index
    %c0_9 = arith.constant 0 : index
    %21 = vector.load %arg3[%c0_8, %c0_9] : memref<1x256xf32, #tpu.memory_space<vmem>>, vector<1x256xf32>
    %22 = vector.broadcast %21 : vector<1x256xf32> to vector<32x256xf32>
    %23 = arith.mulf %20, %22 : vector<32x256xf32>
    %c0_10 = arith.constant 0 : index
    %c0_11 = arith.constant 0 : index
    %24 = vector.load %arg4[%c0_10, %c0_11] : memref<1x256xf32, #tpu.memory_space<vmem>>, vector<1x256xf32>
    %25 = vector.broadcast %24 : vector<1x256xf32> to vector<32x256xf32>
    %26 = arith.addf %23, %25 : vector<32x256xf32>
    %c0_12 = arith.constant 0 : index
    %c0_13 = arith.constant 0 : index
    %27 = vector.load %arg5[%c0_12, %c0_13] : memref<32x256xf32, #tpu.memory_space<vmem>>, vector<32x256xf32>
    tpu.vector_store %arg5[%c0_12, %c0_13], %26 {strides = array<i32>} : memref<32x256xf32, #tpu.memory_space<vmem>>, vector<32x256xf32>,
    return
  }
  func.func @transform_0(%arg0: i32) -> (i32, i32) {
    %c0_i32 = arith.constant 0 : i32
    %c0_i32_0 = arith.constant 0 : i32
    return %arg0, %c0_i32 : i32, i32
  }
  func.func @transform_1(%arg0: i32) -> (i32, i32) {
    %c0_i32 = arith.constant 0 : i32
    %c0_i32_0 = arith.constant 0 : i32
    %c0_i32_1 = arith.constant 0 : i32
    return %c0_i32, %c0_i32_0 : i32, i32
  }
  func.func @transform_2(%arg0: i32) -> (i32, i32) {
    %c0_i32 = arith.constant 0 : i32
    %c0_i32_0 = arith.constant 0 : i32
    %c0_i32_1 = arith.constant 0 : i32
    return %c0_i32, %c0_i32_0 : i32, i32
  }
  func.func @transform_3(%arg0: i32) -> (i32, i32) {
    %c0_i32 = arith.constant 0 : i32
    %c0_i32_0 = arith.constant 0 : i32
    %c0_i32_1 = arith.constant 0 : i32
    return %c0_i32, %c0_i32_0 : i32, i32
  }
  func.func @transform_4(%arg0: i32) -> (i32, i32) {
    %c0_i32 = arith.constant 0 : i32
    %c0_i32_0 = arith.constant 0 : i32
    return %arg0, %c0_i32 : i32, i32
  }
}

</mosaic_0001>

<bundles_post_ra>
// kernel: tpu_custom_call.1
= control target key start
LH: loop header
LB: loop body
LE: loop exit
PB: predicated region body
PF: predicated region fallthrough
CT: control target
= control target key end

     0   :  { %v323_v5 = vmov 0.0   ;;  %vm41_vm0 = vcmask 1040384   ;;  %s448_s0 = inlined_call_operand.vmem [shape: f32[32,17], index: 0, kind: input, shape index: {}]   ;;  %s449_s1 = inlined_call_operand.vmem [shape: f32[17,256], index: 1, kind: input, shape index: {}]   ;;  %s450_s2 = inlined_call_operand.vmem [shape: f32[1,256], index: 2, kind: input, shape index: {}]   ;;  %s451_s3 = inlined_call_operand.vmem [shape: f32[1,256], index: 3, kind: input, shape index: {}]   ;;  %s452_s4 = inlined_call_operand.hbm [shape: f32[32,256], index: 4, kind: output, shape index: {}]  }
   0x1   :  { %v23_v0 = vld [vmem:[%s449_s1 + $0x8] sm:$0xff]  ;;  %v25_v1 = vld [vmem:[%s449_s1 + $0x18] sm:$0xff]  ;;  %v22_v2 = vld [vmem:[%s449_s1] sm:$0xff]  ;;  %112 = vmatprep.mubr.f32.mxu0 %v323_v5  ;;  %124 = vmatprep.mubr.f32.mxu1 %v323_v5 }
   0x2   :  { %v279_v3 = vpack.c.bf16 %v25_v1, %v23_v0  ;;  %v24_v4 = vld [vmem:[%s449_s1 + $0x10] sm:$0xff]  ;;  %v27_v7 = vld [vmem:[%s449_s1 + $0x28] sm:$0x1] }
   0x3   :  { %v281_v6 = vpack.c.bf16 %v24_v4, %v22_v2 }
   0x4   :  { %280 = vmatprep.subr.bf16.mxu0 %v279_v3  ;;  %283 = vmatprep.subr.bf16.mxu1 %v279_v3 }
   0x5   :  { %9 = vsyncpa [#allocation3], 0  ;;  %282 = vmatpush1.bf16.msra.mxu0 %v281_v6  ;;  %285 = vmatpush1.bf16.msra.mxu1 %v281_v6  ;;  %v26_v8 = vld [vmem:[%s449_s1 + $0x20] sm:$0x1]  ;;  %vm28_vm1 = vcmask 138240   ;;  %v20_v10 = vld [vmem:[%s448_s0 + $0x10] sm:$0xff]  ;;  %v211_v44 = vlaneseq }
   0x6   :  { %273 = vmatprep.subr.msk.mxu0 %vm41_vm0, %v27_v7  ;;  %284 = vmatprep.subr.msk.mxu1 %vm41_vm0, %v27_v7  ;;  %v18_v9 = vld [vmem:[%s448_s0] sm:$0xff]  ;;  %v21_v11 = vld [vmem:[%s448_s0 + $0x18] sm:$0xff]  ;;  %v19_v12 = vld [vmem:[%s448_s0 + $0x8] sm:$0xff] }
   0x7   :  { %v212_v52 = vshrl.u32 %v211_v44, 7  ;;  %v209_v2 = vld [vmem:[%s450_s2] sm:$0x3]  ;;  %s324_s2 = smov [#allocation2]  }
   0x8   :  { %v229_v7 = vld [vmem:[%s451_s3] sm:$0x3]  ;;  %s262_s3 = sshll.u32 %s324_s2, 4  ;;  %s263_s3 = int_to_ptr.vmem [resolvable:$true] %s262_s3 }
   0x9   :  { %274 = vmatpush1.msk.msra.mxu0 %vm41_vm0, %v26_v8  ;;  %286 = vmatpush1.msk.msra.mxu1 %vm41_vm0, %v26_v8  ;;  %v213_v62 = vsub.s32 0, %v212_v52  ;;  %v217_v3 = vsub.s32 1, %v212_v52  ;;  %s299_s11 = scalar_lea.vmem %s263_s3, 1024  ;;  %p304_p1 = scmp.lt.s32.totalorder %s263_s3, %s263_s3 }
   0xa   :  { %275 = vmatmul.mubr.msk.f32.vlgmr.msra.gmra.mrb[0].mxu0 %vm28_vm1, %v18_v9  ;;  %277 = vmatmul.mubr.msk.f32.vlgmr.msra.gmra.mrb[0].mxu1 %vm28_vm1, %v20_v10  ;;  %p300_p0 = scmp.ne.s32.totalorder %s263_s3, %s299_s11  ;;  %p305_p2 = scmp.lt.s32.totalorder %s299_s11, %s299_s11 }
   0xb   :  { %130 = vmatprep.mubr.f32.mxu1 %v323_v5  ;;  %118 = vmatprep.mubr.f32.mxu0 %v323_v5  ;;  %v214_v6 = vrot.slane %v209_v2, %v213_v62  ;;  %v218_v10 = vrot.slane %v209_v2, %v217_v3 }
   0xc   :  { %p306_p3 = por %p305_p2, %p304_p1 }
   0xe   :  { %278 = vmatmul.mubr.msk.f32.gmra.mrb[2].mxu1 %vm28_vm1, %v21_v11  ;;  %276 = vmatmul.mubr.msk.f32.gmra.mrb[2].mxu0 %vm28_vm1, %v19_v12  ;;  %v234_v12 = vrot.slane %v229_v7, %v213_v62  ;;  %p307_p4 = pnand %p306_p3, %p300_p0 }
  0xdd   :  { %v382_v13 = vpop.f32.mrb[0].mxu0  ;;  %v384_v14 = vpop.f32.mrb[0].mxu1 }
  0xde   :  { %v386_v15 = vpop.f32.mrb[1].mxu0  ;;  %v388_v16 = vpop.f32.mrb[1].mxu1  ;;  %v149_v17 = vmul.f32 %v382_v13, %v382_v13  ;;  %v153_v18 = vmul.f32 %v384_v14, %v384_v14 }
  0xdf   :  { %v143_v19 = vadd.f32 %v388_v16, %v384_v14  ;;  %v137_v20 = vadd.f32 %v386_v15, %v382_v13  ;;  %v150_v21 = vmul.f32 %v386_v15, %v386_v15  ;;  %v154_v22 = vmul.f32 %v388_v16, %v388_v16 }
  0xe1   :  { %144 = vadd.xlane.f32.xlu1 %v143_v19  ;;  %v402_v23 = vpop.f32.mrb[2].mxu1  ;;  %138 = vadd.xlane.f32.xlu0 %v137_v20  ;;  %v404_v24 = vpop.f32.mrb[2].mxu0  ;;  %v157_v25 = vadd.f32 %v150_v21, %v149_v17  ;;  %v163_v26 = vadd.f32 %v154_v22, %v153_v18  ;;  %v238_v17 = vrot.slane %v229_v7, %v217_v3 }
  0xe2   :  { %v406_v27 = vpop.f32.mrb[3].mxu1  ;;  %v408_v28 = vpop.f32.mrb[3].mxu0  ;;  %v151_v29 = vmul.f32 %v404_v24, %v404_v24  ;;  %v155_v30 = vmul.f32 %v402_v23, %v402_v23 }
  0xe3   :  { %v156_v31 = vmul.f32 %v406_v27, %v406_v27  ;;  %v152_v32 = vmul.f32 %v408_v28, %v408_v28  ;;  %v146_v33 = vadd.f32 %v406_v27, %v402_v23  ;;  %v140_v34 = vadd.f32 %v408_v28, %v404_v24 }
  0xe5   :  { %147 = vadd.xlane.f32.xlu1 %v146_v33  ;;  %158 = vadd.xlane.f32.xlu0 %v157_v25  ;;  %v160_v35 = vadd.f32 %v152_v32, %v151_v29  ;;  %v166_v36 = vadd.f32 %v156_v31, %v155_v30 }
  0xe9   :  { %161 = vadd.xlane.f32.xlu1 %v160_v35  ;;  %141 = vadd.xlane.f32.xlu0 %v140_v34 }
  0xed   :  { %167 = vadd.xlane.f32.xlu1 %v166_v36  ;;  %164 = vadd.xlane.f32.xlu0 %v163_v26 }
 0x16e   :  { %v145_v37 = vpop.xlane.xlu1 %144  ;;  %v139_v38 = vpop.xlane.xlu0 %138 }
 0x16f   :  { %v169_v39 = vmul.f32 0.00390625, %v139_v38  ;;  %v171_v46 = vmul.f32 0.00390625, %v145_v37 }
 0x171   :  { %v177_v42 = vmul.f32 %v169_v39, %v169_v39  ;;  %v179_v56 = vmul.f32 %v171_v46, %v171_v46  ;;  %v193_v8 = vsub.f32 %v382_v13, %v169_v39  ;;  %v194_v9 = vsub.f32 %v386_v15, %v169_v39 }
 0x172   :  { %v148_v40 = vpop.xlane.xlu1 %147  ;;  %v159_v41 = vpop.xlane.xlu0 %158  ;;  %v197_v34 = vsub.f32 %v384_v14, %v171_v46  ;;  %v198_v35 = vsub.f32 %v388_v16, %v171_v46 }
 0x173   :  { %v173_v43 = vmul.f32 0.00390625, %v159_v41  ;;  %v172_v49 = vmul.f32 0.00390625, %v148_v40 }
 0x175   :  { %v181_v45 = vsub.f32 %v173_v43, %v177_v42  ;;  %v180_v59 = vmul.f32 %v172_v49, %v172_v49  ;;  %v199_v13 = vsub.f32 %v402_v23, %v172_v49  ;;  %v200_v15 = vsub.f32 %v406_v27, %v172_v49 }
 0x176   :  { %v162_v47 = vpop.xlane.xlu1 %161  ;;  %v142_v48 = vpop.xlane.xlu0 %141 }
 0x177   :  { %v185_v50 = vadd.f32 1e-05, %v181_v45  ;;  %v170_v51 = vmul.f32 0.00390625, %v142_v48  ;;  %v174_v53 = vmul.f32 0.00390625, %v162_v47 }
 0x179   :  { %291 = vrsqrt.f32 %v185_v50  ;;  %v178_v54 = vmul.f32 %v170_v51, %v170_v51  ;;  %v195_v26 = vsub.f32 %v404_v24, %v170_v51  ;;  %v196_v29 = vsub.f32 %v408_v28, %v170_v51 }
 0x17a   :  { %v168_v55 = vpop.xlane.xlu1 %167  ;;  %v165_v57 = vpop.xlane.xlu0 %164 }
 0x17b   :  { %v182_v58 = vsub.f32 %v174_v53, %v178_v54  ;;  %v176_v60 = vmul.f32 0.00390625, %v168_v55  ;;  %v175_v61 = vmul.f32 0.00390625, %v165_v57 }
 0x17d   :  { %v186_v63 = vadd.f32 1e-05, %v182_v58  ;;  %v184_v0 = vsub.f32 %v176_v60, %v180_v59  ;;  %v183_v1 = vsub.f32 %v175_v61, %v179_v56 }
 0x17f   :  { %293 = vrsqrt.f32 %v186_v63  ;;  %v188_v4 = vadd.f32 1e-05, %v184_v0  ;;  %v187_v5 = vadd.f32 1e-05, %v183_v1 }
 0x181   :  { %295 = vrsqrt.f32 %v188_v4 }
 0x182   :  { %297 = vrsqrt.f32 %v187_v5 }
 0x183   :  { %v292_v11 = vpop.eup %291 }
 0x184   :  { %v201_v18 = vmul.f32 %v292_v11, %v193_v8  ;;  %v202_v19 = vmul.f32 %v292_v11, %v194_v9 }
 0x186   :  { %v221_v20 = vmul.f32 %v214_v6, %v201_v18  ;;  %v222_v21 = vmul.f32 %v218_v10, %v202_v19 }
 0x188   :  { %v241_v22 = vadd.f32 %v234_v12, %v221_v20  ;;  %v242_v25 = vadd.f32 %v238_v17, %v222_v21 }
 0x189   :  { %v294_v30 = vpop.eup %293 }
 0x18a   :  { %249 = vst [vmem:[#allocation2] sm:$0xff] %v241_v22  ;;  %250 = vst [vmem:[#allocation2 + $0x8] sm:$0xff] %v242_v25  ;;  %v203_v31 = vmul.f32 %v294_v30, %v195_v26  ;;  %v204_v32 = vmul.f32 %v294_v30, %v196_v29 }
 0x18b   :  { %v296_v33 = vpop.eup %295 }
 0x18c   :  { %v298_v36 = vpop.eup %297  ;;  %v223_v37 = vmul.f32 %v214_v6, %v203_v31  ;;  %v224_v38 = vmul.f32 %v218_v10, %v204_v32  ;;  %v207_v24 = vmul.f32 %v296_v33, %v199_v13  ;;  %v208_v39 = vmul.f32 %v296_v33, %v200_v15 }
 0x18d   :  { %v205_v28 = vmul.f32 %v298_v36, %v197_v34  ;;  %v206_v40 = vmul.f32 %v298_v36, %v198_v35 }
 0x18e   :  { %v243_v23 = vadd.f32 %v234_v12, %v223_v37  ;;  %v244_v27 = vadd.f32 %v238_v17, %v224_v38  ;;  %v227_v41 = vmul.f32 %v214_v6, %v207_v24  ;;  %v228_v42 = vmul.f32 %v218_v10, %v208_v39 }
 0x18f   :  { %v225_v43 = vmul.f32 %v214_v6, %v205_v28  ;;  %v226_v44 = vmul.f32 %v218_v10, %v206_v40 }
 0x190   :  { %251 = vst [vmem:[#allocation2 + $0x10] sm:$0xff] %v243_v23  ;;  %252 = vst [vmem:[#allocation2 + $0x18] sm:$0xff] %v244_v27  ;;  %v247_v14 = vadd.f32 %v234_v12, %v227_v41  ;;  %v248_v45 = vadd.f32 %v238_v17, %v228_v42 }
 0x191   :  { %v245_v16 = vadd.f32 %v234_v12, %v225_v43  ;;  %v246_v46 = vadd.f32 %v238_v17, %v226_v44 }
 0x192   :  { %255 = vst [vmem:[#allocation2 + $0x30] sm:$0xff] %v247_v14  ;;  %256 = vst [vmem:[#allocation2 + $0x38] sm:$0xff] %v248_v45 }
 0x193   :  { %253 = vst [vmem:[#allocation2 + $0x20] sm:$0xff] %v245_v16  ;;  %254 = vst [vmem:[#allocation2 + $0x28] sm:$0xff] %v246_v46 }
 0x194   :  { %310 = shalt.err (!%p307_p4)
}
 0x195   :  { %s311_s14 = scalar_lea.hbm %s452_s4, 1024 }
 0x196   :  { %p312_p5 = scmp.ne.s32.totalorder %s452_s4, %s311_s14  ;;  %p315_p6 = scmp.lt.u32.totalorder %s311_s14, %s452_s4 }
 0x198   :  { %p317_p7 = pnand %p315_p6, %p312_p5 }
 0x19a   :  { %320 = shalt.err (!%p317_p7)
}
 0x19b   :  { %s325_s19 = smov 256   ;;  %s326_s20 = smov 16  }
 0x19c   :  { %268 = dma.vmem_to_hbm [thread:$0]  %s263_s3, 1024, %s452_s4, [#allocation3], %s325_s19, %s325_s19, %s326_s20  }
 0x19d   :  { %321 = dma.done.wait [#allocation3], 1024  }
 0x19e   :  { %322 = vsyncadd [#allocation3], 4294966272 }
 0x19f   :  { %272 = vsyncpa [#allocation3], 1 }

</bundles_post_ra>
